<compile_context>
chip_gen: v6e
topology: v6e:2x2x1
jax: 0.10.0
libtpu: 0.0.40
codegen_flags: <defaults>
</compile_context>

<pallas_src>
import jax
import jax.numpy as jnp
from jax import lax
from jax.experimental import pallas as pl
from jax.experimental.pallas import tpu as pltpu


def _discourse_kernel(par_ref, sent_ref, w1_ref, b1_ref, w2_ref, b2_ref, out_ref):
    tile_m = out_ref.shape[0]
    s_len, two_h = sent_ref.shape
    base = pl.program_id(0) * tile_m

    sent = sent_ref[...]                                        # (S, 2H), resident

    # One-hot selectors: tile row j corresponds to DU index (base + j), i.e.
    # sentence (base + j + 1) and its parent parents[base + j + 1].
    cols = lax.broadcasted_iota(jnp.int32, (tile_m, s_len), 1)
    rows = lax.broadcasted_iota(jnp.int32, (tile_m, s_len), 0)
    cur_idx = jnp.minimum(rows + (base + 1), s_len - 1)         # clamp masked tail rows
    par_idx = jnp.clip(par_ref[...], 0, s_len - 1)              # (tile_m, 1), take-style clamp
    sel_cur = (cols == cur_idx).astype(sent.dtype)              # (tile_m, S)
    sel_par = (cols == par_idx).astype(sent.dtype)              # (tile_m, S)

    # In-kernel gather as two tiny MXU matmuls against the resident sent block.
    x_cur = jnp.dot(sel_cur, sent, preferred_element_type=jnp.float32)
    x_par = jnp.dot(sel_par, sent, preferred_element_type=jnp.float32)
    du = jnp.concatenate([x_cur, x_par], axis=1)                # (tile_m, 4H)

    # Fused MLP: one K=4H matmul, bias + tanh, one K=2H matmul (f32 accumulate).
    h = jnp.tanh(jnp.dot(du, w1_ref[...], preferred_element_type=jnp.float32)
                 + b1_ref[...])
    out_ref[...] = (jnp.dot(h, w2_ref[...], preferred_element_type=jnp.float32)
                    + b2_ref[...]).astype(out_ref.dtype)


def _round_up(x, m):
    return ((x + m - 1) // m) * m


def discourse_act_forward(sent_encoding, parents, params, *, tile_m=256):
    """sent_encoding: (1, S, 2H) f32; parents: (S,) int; -> (S-1, out_dim) f32."""
    w1, b1, w2, b2 = params["w1"], params["b1"], params["w2"], params["b2"]
    sent = jnp.squeeze(sent_encoding, axis=0).astype(jnp.float32)   # (S, 2H)
    S, two_h = sent.shape
    assert S >= 2, "need at least two discourse units"
    out_dim = w2.shape[0]
    n = S - 1

    # Row tile: multiple of 8; when n is moderate, split into >= 2 tiles so the
    # "parallel" grid axis can feed both TensorCores on v7x (no-op on v5e/v6e).
    if n > 16:
        tile_m = min(tile_m, _round_up(pl.cdiv(n, 2), 8))
    tile_m = max(8, min(tile_m, _round_up(n, 8)))
    num_tiles = pl.cdiv(n, tile_m)
    n_pad = num_tiles * tile_m

    # Parent index of DU row j is parents[j + 1]; pad the tiny int32 vector to
    # the grid extent so every (tile_m, 1) block is in bounds (values are also
    # clamped in-kernel, jnp.take-style).
    par2d = jnp.pad(parents[1:].astype(jnp.int32), (0, n_pad - n)).reshape(n_pad, 1)

    # PyTorch Linear weight is (out, in); kernel wants (in, out).
    w1_t = w1.T.astype(jnp.float32)                    # (4H, 2H)
    w2_t = w2.T.astype(jnp.float32)                    # (2H, out_dim)
    b1_2d = b1.reshape(1, two_h).astype(jnp.float32)
    b2_2d = b2.reshape(1, out_dim).astype(jnp.float32)

    # VMEM budget derived from actual buffer sizes (+ headroom), capped at the
    # v7x physical budget; v5e/v6e (128 MiB) are comfortably covered.
    fp = 4
    resident = fp * (S * two_h + 2 * two_h * two_h + two_h + two_h * out_dim + out_dim)
    per_step = fp * (2 * (tile_m * out_dim + tile_m)           # double-buffered out / parent tiles
                     + 6 * tile_m * max(S, 2 * two_h))         # selector / du temporaries
    vmem_limit = int(min(64 * 1024 * 1024,
                         max(16 * 1024 * 1024,
                             2 * resident + per_step + 8 * 1024 * 1024)))

    res = lambda shape: pl.BlockSpec(shape, lambda i: (0, 0))  # VMEM-resident (fixed block)

    return pl.pallas_call(
        _discourse_kernel,
        out_shape=jax.ShapeDtypeStruct((n, out_dim), jnp.float32),
        grid=(num_tiles,),
        in_specs=[
            pl.BlockSpec((tile_m, 1), lambda i: (i, 0)),       # parent ids (row-tiled)
            res((S, two_h)),                                   # sent (resident)
            res((2 * two_h, two_h)),                           # W1^T (fused 4H x 2H)
            res((1, two_h)),                                   # b1
            res((two_h, out_dim)),                             # W2^T
            res((1, out_dim)),                                 # b2
        ],
        out_specs=pl.BlockSpec((tile_m, out_dim), lambda i: (i, 0)),
        compiler_params=pltpu.CompilerParams(
            dimension_semantics=("parallel",),
            vmem_limit_bytes=vmem_limit,
        ),
    )(par2d, sent, w1_t, b1_2d, w2_t, b2_2d)


def init_params(key, hidden_dim, out_dim):
    """Deterministic xavier-uniform-like init matching the PyTorch shapes."""
    k1, k2 = jax.random.split(key)
    in1, out1 = hidden_dim * 2 * 2, hidden_dim * 2      # pre_pred: (2H) <- (4H)
    in2, out2 = hidden_dim * 2, out_dim                 # pred:     (out) <- (2H)
    lim1 = (6.0 / (in1 + out1)) ** 0.5
    lim2 = (6.0 / (in2 + out2)) ** 0.5
    return {
        "w1": jax.random.uniform(k1, (out1, in1), jnp.float32, -lim1, lim1),
        "b1": jnp.zeros((out1,), jnp.float32),
        "w2": jax.random.uniform(k2, (out2, in2), jnp.float32, -lim2, lim2),
        "b2": jnp.zeros((out2,), jnp.float32),
    }


def reference_forward(sent_encoding, parents, params):
    """Pure-JAX f32 reference of the PyTorch module (eval mode)."""
    sent = jnp.squeeze(sent_encoding, axis=0)
    x_cur = sent[1:, :]
    x_par = jnp.take(sent, parents[1:], axis=0)
    du = jnp.concatenate([x_cur, x_par], axis=-1)
    hi = lax.Precision.HIGHEST
    h = jnp.tanh(jnp.dot(du, params["w1"].T, precision=hi) + params["b1"])
    return jnp.dot(h, params["w2"].T, precision=hi) + params["b2"]


if __name__ == "__main__":
    hidden_dim = 16      # sent feature dim 2H = 32, pre_pred input = 4H = 64
    out_dim = 8
    seq_len = 8

    key = jax.random.PRNGKey(0)
    k_enc, k_par, k_params = jax.random.split(key, 3)

    sent_encoding = jax.random.normal(k_enc, (1, seq_len, 2 * hidden_dim), jnp.float32)
    # parents[i] is the index of node i's parent (any valid index < seq_len).
    parents = jax.random.randint(k_par, (seq_len,), 0, seq_len, jnp.int32)
    params = init_params(k_params, hidden_dim, out_dim)

    out = discourse_act_forward(sent_encoding, parents, params)
    out = jax.block_until_ready(out)

    ref = reference_forward(sent_encoding, parents, params)
    assert out.shape == (seq_len - 1, out_dim), out.shape
    # f32 end-to-end; tolerance allows for reduced-precision MXU passes.
    assert jnp.allclose(out, ref, atol=2e-2, rtol=2e-2), (
        float(jnp.max(jnp.abs(out - ref))))

    print("KERNEL_OK")
</pallas_src>

<mosaic_0001>
module attributes {stable_mosaic.version = 11 : i64} {
  func.func @_discourse_kernel(%arg0: i32, %arg1: memref<8x1xi32, #tpu.memory_space<vmem>>, %arg2: memref<8x32xf32, #tpu.memory_space<vmem>>, %arg3: memref<64x32xf32, #tpu.memory_space<vmem>>, %arg4: memref<1x32xf32, #tpu.memory_space<vmem>>, %arg5: memref<32x8xf32, #tpu.memory_space<vmem>>, %arg6: memref<1x8xf32, #tpu.memory_space<vmem>>, %arg7: memref<8x8xf32, #tpu.memory_space<vmem>>) attributes {dimension_semantics = [#tpu.dimension_semantics<parallel>], iteration_bounds = array<i64: 1>, scalar_prefetch = 0 : i64, scratch_operands = 0 : i64, tpu.core_type = #tpu.core_type<tc>, window_params = [{transform_indices = @transform_0, window_bounds = array<i64: 8, 1>}, {pipeline_mode = #tpu.pipeline_mode<synchronous>, transform_indices = @transform_1, window_bounds = array<i64: 8, 32>}, {pipeline_mode = #tpu.pipeline_mode<synchronous>, transform_indices = @transform_2, window_bounds = array<i64: 64, 32>}, {pipeline_mode = #tpu.pipeline_mode<synchronous>, transform_indices = @transform_3, window_bounds = array<i64: 1, 32>}, {pipeline_mode = #tpu.pipeline_mode<synchronous>, transform_indices = @transform_4, window_bounds = array<i64: 32, 8>}, {pipeline_mode = #tpu.pipeline_mode<synchronous>, transform_indices = @transform_5, window_bounds = array<i64: 1, 8>}, {transform_indices = @transform_6, window_bounds = array<i64: 8, 8>}]} {
    %c8_i32 = arith.constant 8 : i32
    %0 = arith.muli %arg0, %c8_i32 : i32
    %c0 = arith.constant 0 : index
    %c0_0 = arith.constant 0 : index
    %1 = vector.load %arg2[%c0, %c0_0] : memref<8x32xf32, #tpu.memory_space<vmem>>, vector<8x32xf32>
    %2 = tpu.iota {dimensions = array<i32: 1>} : vector<8x8xi32>
    %3 = tpu.iota {dimensions = array<i32: 0>} : vector<8x8xi32>
    %c1_i32 = arith.constant 1 : i32
    %4 = arith.addi %0, %c1_i32 : i32
    %5 = vector.broadcast %4 : i32 to vector<8x8xi32>
    %6 = arith.addi %3, %5 : vector<8x8xi32>
    %c7_i32 = arith.constant 7 : i32
    %7 = vector.broadcast %c7_i32 : i32 to vector<8x8xi32>
    %8 = arith.minsi %6, %7 : vector<8x8xi32>
    %c0_1 = arith.constant 0 : index
    %c0_2 = arith.constant 0 : index
    %9 = vector.load %arg1[%c0_1, %c0_2] : memref<8x1xi32, #tpu.memory_space<vmem>>, vector<8x1xi32>
    %c0_i32 = arith.constant 0 : i32
    %c7_i32_3 = arith.constant 7 : i32
    %10 = vector.broadcast %c0_i32 : i32 to vector<8x1xi32>
    %11 = arith.maxsi %10, %9 : vector<8x1xi32>
    %12 = vector.broadcast %c7_i32_3 : i32 to vector<8x1xi32>
    %13 = arith.minsi %12, %11 : vector<8x1xi32>
    %14 = arith.cmpi eq, %2, %8 : vector<8x8xi32>
    %15 = arith.extui %14 : vector<8x8xi1> to vector<8x8xi32>
    %16 = arith.sitofp %15 : vector<8x8xi32> to vector<8x8xf32>
    %17 = vector.broadcast %13 : vector<8x1xi32> to vector<8x8xi32>
    %18 = arith.cmpi eq, %2, %17 : vector<8x8xi32>
    %19 = arith.extui %18 : vector<8x8xi1> to vector<8x8xi32>
    %20 = arith.sitofp %19 : vector<8x8xi32> to vector<8x8xf32>
    %cst = arith.constant dense<0.000000e+00> : vector<8x32xf32>
    %21 = tpu.matmul %16, %1, %cst {dimension_numbers = #tpu.dot_dimension_numbers<[1], [0], [0], [1], [0, 0, 1, 1], [], []>} : vector<8x8xf32>, vector<8x32xf32>, vector<8x32xf32> -> vector<8x32xf32>
    %cst_4 = arith.constant dense<0.000000e+00> : vector<8x32xf32>
    %22 = tpu.matmul %20, %1, %cst_4 {dimension_numbers = #tpu.dot_dimension_numbers<[1], [0], [0], [1], [0, 0, 1, 1], [], []>} : vector<8x8xf32>, vector<8x32xf32>, vector<8x32xf32> -> vector<8x32xf32>
    %23 = tpu.concatenate %21, %22 in 1 : vector<8x32xf32>, vector<8x32xf32> -> vector<8x64xf32>
    %c0_5 = arith.constant 0 : index
    %c0_6 = arith.constant 0 : index
    %24 = vector.load %arg3[%c0_5, %c0_6] : memref<64x32xf32, #tpu.memory_space<vmem>>, vector<64x32xf32>
    %cst_7 = arith.constant dense<0.000000e+00> : vector<8x32xf32>
    %25 = tpu.matmul %23, %24, %cst_7 {dimension_numbers = #tpu.dot_dimension_numbers<[1], [0], [0], [1], [0, 0, 1, 1], [], []>} : vector<8x64xf32>, vector<64x32xf32>, vector<8x32xf32> -> vector<8x32xf32>
    %c0_8 = arith.constant 0 : index
    %c0_9 = arith.constant 0 : index
    %26 = vector.load %arg4[%c0_8, %c0_9] : memref<1x32xf32, #tpu.memory_space<vmem>>, vector<1x32xf32>
    %27 = vector.broadcast %26 : vector<1x32xf32> to vector<8x32xf32>
    %28 = arith.addf %25, %27 : vector<8x32xf32>
    %29 = math.tanh %28 : vector<8x32xf32>
    %c0_10 = arith.constant 0 : index
    %c0_11 = arith.constant 0 : index
    %30 = vector.load %arg5[%c0_10, %c0_11] : memref<32x8xf32, #tpu.memory_space<vmem>>, vector<32x8xf32>
    %cst_12 = arith.constant dense<0.000000e+00> : vector<8x8xf32>
    %31 = tpu.matmul %29, %30, %cst_12 {dimension_numbers = #tpu.dot_dimension_numbers<[1], [0], [0], [1], [0, 0, 1, 1], [], []>} : vector<8x32xf32>, vector<32x8xf32>, vector<8x8xf32> -> vector<8x8xf32>
    %c0_13 = arith.constant 0 : index
    %c0_14 = arith.constant 0 : index
    %32 = vector.load %arg6[%c0_13, %c0_14] : memref<1x8xf32, #tpu.memory_space<vmem>>, vector<1x8xf32>
    %33 = vector.broadcast %32 : vector<1x8xf32> to vector<8x8xf32>
    %34 = arith.addf %31, %33 : vector<8x8xf32>
    %c0_15 = arith.constant 0 : index
    %c0_16 = arith.constant 0 : index
    %35 = vector.load %arg7[%c0_15, %c0_16] : memref<8x8xf32, #tpu.memory_space<vmem>>, vector<8x8xf32>
    tpu.vector_store %arg7[%c0_15, %c0_16], %34 {strides = array<i32>} : memref<8x8xf32, #tpu.memory_space<vmem>>, vector<8x8xf32>,
    return
  }
  func.func @transform_0(%arg0: i32) -> (i32, i32) {
    %c0_i32 = arith.constant 0 : i32
    %c0_i32_0 = arith.constant 0 : i32
    return %arg0, %c0_i32 : i32, i32
  }
  func.func @transform_1(%arg0: i32) -> (i32, i32) {
    %c0_i32 = arith.constant 0 : i32
    %c0_i32_0 = arith.constant 0 : i32
    %c0_i32_1 = arith.constant 0 : i32
    return %c0_i32, %c0_i32_0 : i32, i32
  }
  func.func @transform_2(%arg0: i32) -> (i32, i32) {
    %c0_i32 = arith.constant 0 : i32
    %c0_i32_0 = arith.constant 0 : i32
    %c0_i32_1 = arith.constant 0 : i32
    return %c0_i32, %c0_i32_0 : i32, i32
  }
  func.func @transform_3(%arg0: i32) -> (i32, i32) {
    %c0_i32 = arith.constant 0 : i32
    %c0_i32_0 = arith.constant 0 : i32
    %c0_i32_1 = arith.constant 0 : i32
    return %c0_i32, %c0_i32_0 : i32, i32
  }
  func.func @transform_4(%arg0: i32) -> (i32, i32) {
    %c0_i32 = arith.constant 0 : i32
    %c0_i32_0 = arith.constant 0 : i32
    %c0_i32_1 = arith.constant 0 : i32
    return %c0_i32, %c0_i32_0 : i32, i32
  }
  func.func @transform_5(%arg0: i32) -> (i32, i32) {
    %c0_i32 = arith.constant 0 : i32
    %c0_i32_0 = arith.constant 0 : i32
    %c0_i32_1 = arith.constant 0 : i32
    return %c0_i32, %c0_i32_0 : i32, i32
  }
  func.func @transform_6(%arg0: i32) -> (i32, i32) {
    %c0_i32 = arith.constant 0 : i32
    %c0_i32_0 = arith.constant 0 : i32
    return %arg0, %c0_i32 : i32, i32
  }
}

</mosaic_0001>

<bundles_post_ra>
// kernel: tpu_custom_call.1
= control target key start
LH: loop header
LB: loop body
LE: loop exit
PB: predicated region body
PF: predicated region fallthrough
CT: control target
= control target key end

     0   :  { %v26_v2 = vlaneseq  ;;  %v487_v3 = vmov 0   ;;  %v488_v4 = vmov 0.0   ;;  %s607_s0 = inlined_call_operand.vmem [shape: s32[8,1], index: 0, kind: input, shape index: {}]   ;;  %s608_s1 = inlined_call_operand.vmem [shape: f32[8,32], index: 1, kind: input, shape index: {}]   ;;  %s609_s2 = inlined_call_operand.vmem [shape: f32[64,32], index: 2, kind: input, shape index: {}]   ;;  %s610_s3 = inlined_call_operand.vmem [shape: f32[1,32], index: 3, kind: input, shape index: {}]   ;;  %s611_s4 = inlined_call_operand.vmem [shape: f32[32,8], index: 4, kind: input, shape index: {}]   ;;  %s612_s5 = inlined_call_operand.vmem [shape: f32[1,8], index: 5, kind: input, shape index: {}]   ;;  %s613_s6 = inlined_call_operand.hbm [shape: f32[7,8], index: 6, kind: output, shape index: {}]  }
   0x1   :  { %v35_v0 = vld [vmem:[%s607_s0] sm:$0xff]  ;;  %462 = vset.pattern.permute.xlu0 %v487_v3  ;;  %417 = vmatprep.subr.mxu1 %v488_v4 }
   0x2   :  { %v25_v1 = vld [vmem:[%s608_s1] sm:$0xff]  ;;  %vm36_vm0 = vcmp.gt.s32.totalorder %v35_v0, 0 }
   0x3   :  { %11 = vsyncpa [#allocation3], 0  ;;  %v37_v5 = vsel %vm36_vm0, %v35_v0, 0  ;;  %418 = vmatpush3.msra.mxu1 %v25_v1  ;;  %vm489_vm1 = vmmov 0   ;;  %v29_v6 = vshrl.u32 %v26_v2, 7  ;;  %427 = vmatprep.subr.mxu0 %v488_v4  ;;  %v27_v8 = vand.u32 127, %v26_v2 }
   0x4   :  { %419 = vmatprep.mubr.msk.f32.mxu1 %vm489_vm1, %v488_v4  ;;  %vm38_vm2 = vcmp.lt.s32.totalorder %v37_v5, 7  ;;  %422 = vmatprep.subr.mxu1 %v488_v4  ;;  %vm49_vm4 = vcmask 64512   ;;  %v209_v14 = vld [vmem:[%s609_s2 + $0x38] sm:$0xff]  ;;  %v208_v15 = vld [vmem:[%s609_s2 + $0x30] sm:$0xff]  ;;  %v207_v16 = vld [vmem:[%s609_s2 + $0x28] sm:$0xff]  ;;  %s490_s15 = smov 32  }
   0x5   :  { %v39_v7 = vsel %vm38_vm2, %v37_v5, 7  ;;  %v32_v9 = vadd.s32 1, %v29_v6  ;;  %443 = vmatprep.mubr.msk.f32.mxu0 %vm489_vm1, %v488_v4  ;;  %428 = vmatpush3.msra.mxu0 %v209_v14  ;;  %v206_v17 = vld [vmem:[%s609_s2 + $0x20] sm:$0xff]  ;;  %v205_v19 = vld [vmem:[%s609_s2 + $0x18] sm:$0xff]  ;;  %v204_v21 = vld [vmem:[%s609_s2 + $0x10] sm:$0xff]  ;;  %vm200_vm7 = vcmask 261120  }
   0x6   :  { %44 = vperm.xlu0 %462, %v39_v7   ;;  %429 = vmatprep.subr.mxu0 %v488_v4  ;;  %v203_v22 = vld [vmem:[%s609_s2 + $0x8] sm:$0xff]  ;;  %v202_v23 = vld [vmem:[%s609_s2] sm:$0xff]  ;;  %vm217_vm8 = vcmask 523264   ;;  %v295_v28 = vld [vmem:[%s611_s4 + $0x18] sm:$0xff] }
   0x7   :  { %vm33_vm3 = vcmp.lt.s32.totalorder %v32_v9, 7  ;;  %430 = vmatpush3.msra.mxu0 %v208_v15  ;;  %v294_v29 = vld [vmem:[%s611_s4 + $0x10] sm:$0xff]  ;;  %v293_v30 = vld [vmem:[%s611_s4 + $0x8] sm:$0xff]  ;;  %v292_v31 = vld [vmem:[%s611_s4] sm:$0xff]  ;;  %s491_s4 = smov [#allocation2]  }
   0x8   :  { %v34_v10 = vsel %vm33_vm3, %v32_v9, 7  ;;  %431 = vmatprep.subr.mxu0 %v488_v4  ;;  %v395_v32 = vld [vmem:[%s610_s3] ss:$0 sm:$0xff]  ;;  %s383_s25 = sshll.u32 %s491_s4, 4  ;;  %s384_s25 = int_to_ptr.vmem [resolvable:$true] %s383_s25 }
   0x9   :  { %vm40_vm5 = vcmp.eq.s32.totalorder %v27_v8, %v34_v10  ;;  %432 = vmatpush3.msra.mxu0 %v207_v16  ;;  %v397_v37 = vld [vmem:[%s612_s5] ss:$0 sm:$0xff]  ;;  %s465_s3 = scalar_lea.vmem %s384_s25, 128  ;;  %p470_p1 = scmp.lt.s32.totalorder %s384_s25, %s384_s25 }
   0xa   :  { %v391_v11 = vsel %vm40_vm5, 1.0, %v488_v4  ;;  %433 = vmatprep.subr.mxu0 %v488_v4  ;;  %p466_p0 = scmp.ne.s32.totalorder %s384_s25, %s465_s3  ;;  %p471_p2 = scmp.lt.s32.totalorder %s465_s3, %s465_s3 }
   0xb   :  { %420 = vmatmul.mubr.msk.f32.vlgmr.msra.gmra.mxu1 %vm49_vm4, %v391_v11  ;;  %434 = vmatpush3.msra.mxu0 %v206_v17 }
   0xc   :  { %423 = vmatpush3.msra.mxu1 %v25_v1  ;;  %424 = vmatprep.mubr.msk.f32.mxu1 %vm489_vm1, %v488_v4  ;;  %p472_p3 = por %p471_p2, %p470_p1 }
   0xd   :  { %446 = vmatprep.subr.mxu1 %v488_v4  ;;  %435 = vmatprep.subr.mxu0 %v488_v4 }
   0xe   :  { %436 = vmatpush3.msra.mxu0 %v205_v19  ;;  %p473_p4 = pnand %p472_p3, %p466_p0 }
   0xf   :  { %437 = vmatprep.subr.mxu0 %v488_v4 }
  0x10   :  { %438 = vmatpush3.msra.mxu0 %v204_v21 }
  0x11   :  { %439 = vmatprep.subr.mxu0 %v488_v4 }
  0x12   :  { %440 = vmatpush3.msra.mxu0 %v203_v22 }
  0x13   :  { %441 = vmatprep.subr.mxu0 %v488_v4 }
  0x14   :  { %442 = vmatpush3.msra.mxu0 %v202_v23 }
  0x81   :  { %v45_v12 = vpop.permute.xlu0 %44 }
  0x82   :  { %vm46_vm6 = vcmp.eq.s32.totalorder %v27_v8, %v45_v12 }
  0x83   :  { %v392_v13 = vsel %vm46_vm6, 1.0, %v488_v4 }
  0x84   :  { %425 = vmatmul.mubr.msk.f32.vlgmr.msra.gmra.mxu1 %vm49_vm4, %v392_v13 }
  0x85   :  { %454 = vmatprep.mubr.msk.f32.mxu1 %vm489_vm1, %v488_v4  ;;  %447 = vmatpush3.msra.mxu1 %v295_v28 }
  0x86   :  { %448 = vmatprep.subr.mxu1 %v488_v4 }
  0x87   :  { %449 = vmatpush3.msra.mxu1 %v294_v29 }
  0x88   :  { %450 = vmatprep.subr.mxu1 %v488_v4 }
  0x89   :  { %451 = vmatpush3.msra.mxu1 %v293_v30 }
  0x8a   :  { %452 = vmatprep.subr.mxu1 %v488_v4 }
  0x8b   :  { %453 = vmatpush3.msra.mxu1 %v292_v31 }
  0xcb   :  { %v119_v18 = vpop.f32.mrf.mxu1 }
  0xcd   :  { %v421_v20 = vpop.f32.mrf.mxu1 }
 0x144   :  { %v192_v24 = vpop.f32.mrf.mxu1 }
 0x145   :  { %197 = vrot.lane.b32.xlu0 %v192_v24, %s490_s15 }
 0x146   :  { %v426_v25 = vpop.f32.mrf.mxu1 }
 0x1b7   :  { %v198_v26 = vpop.permute.xlu0 %197 }
 0x1b8   :  { %v201_v27 = vsel %vm200_vm7, %v119_v18, %v198_v26 }
 0x1b9   :  { %444 = vmatmul.mubr.msk.f32.vlgmr.msra.gmra.mxu0 %vm217_vm8, %v201_v27 }
 0x279   :  { %v287_v33 = vpop.f32.mrf.mxu0 }
 0x27a   :  { %v288_v34 = vadd.f32 %v395_v32, %v287_v33 }
 0x27b   :  { %v445_v35 = vpop.f32.mrf.mxu0 }
 0x27c   :  { %463 = vtanh.f32 %v288_v34 }
 0x289   :  { %v464_v36 = vpop.eup %463 }
 0x28a   :  { %455 = vmatmul.mubr.msk.f32.vlgmr.msra.gmra.mxu1 %vm200_vm7, %v464_v36 }
 0x34a   :  { %v372_v38 = vpop.f32.mrf.mxu1 }
 0x34b   :  { %v373_v39 = vadd.f32 %v397_v37, %v372_v38 }
 0x34c   :  { %v456_v40 = vpop.f32.mrf.mxu1 }
 0x34d   :  { %376 = vst.msk [vmem:[#allocation2] sm:$0xff] %vm49_vm4, %v373_v39 }
 0x34e   :  { %476 = shalt.err (!%p473_p4)
}
 0x34f   :  { %386 = dma.vmem_to_hbm [thread:$0]  %s384_s25, 128, %s613_s6, [#allocation3]  }
 0x350   :  { %485 = dma.done.wait [#allocation3], 128  }
 0x351   :  { %486 = vsyncadd [#allocation3], 4294967168 }
 0x352   :  { %390 = vsyncpa [#allocation3], 1 }

</bundles_post_ra>
